<compile_context>
chip_gen: v6e
topology: v6e:2x2x1
jax: 0.10.0
libtpu: 0.0.40
codegen_flags: <defaults>
</compile_context>

<pallas_src>
import jax
import jax.numpy as jnp
from jax.experimental import pallas as pl
from jax.experimental.pallas import tpu as pltpu


def _round_up(x, m):
    return -(-x // m) * m


def _block1_end_kernel(x_ref, w_ref, b_ref, o_ref):
    # x_ref: (Cp, TL)   w_ref: (Cp, Cp)   b_ref: (Cp, 1)   o_ref: (Cp, TL)
    # Weight already carries the 2.0 factor (folded in the wrapper).
    y = jnp.dot(w_ref[...], x_ref[...], preferred_element_type=jnp.float32)
    y = y + b_ref[...]                       # (Cp,1) broadcasts over lanes
    o_ref[...] = jnp.maximum(y, 0.0).astype(o_ref.dtype)


def basic_block_1_forward(x, w_end, b_end, *, max_lane_tile=512):
    """Effective forward of BasicBlock_1.

    x:     (N, C, L) float32
    w_end: (C, C)    float32  (1x1 conv weight, kernel dim squeezed; rows = out ch)
    b_end: (C,)      float32
    returns relu(conv1x1(2*x))  with shape (N, C, L).
    """
    n, c, l = x.shape
    total = n * l

    # --- layout plumbing (wrapper-side, not compute) -------------------------
    cp = _round_up(c, 8)                                  # sublane-align channels
    lt = min(max_lane_tile, _round_up(total, 128))        # lane tile (mult of 128)
    padded_total = _round_up(total, lt)                   # lane-dense, tile-aligned

    # (N,C,L) -> (C, N*L): one matmul for all batches, lanes = N*L.
    x2d = jnp.transpose(x, (1, 0, 2)).reshape(c, total)
    x2d = jnp.pad(x2d, ((0, cp - c), (0, padded_total - total)))

    # Fold the `out += identity` doubling into the weight (bias untouched).
    w2 = jnp.pad(2.0 * w_end, ((0, cp - c), (0, cp - c)))
    b2 = jnp.pad(b_end, (0, cp - c)).reshape(cp, 1)

    grid = (padded_total // lt,)

    out2d = pl.pallas_call(
        _block1_end_kernel,
        out_shape=jax.ShapeDtypeStruct((cp, padded_total), x.dtype),
        grid_spec=pltpu.PrefetchScalarGridSpec(
            num_scalar_prefetch=0,
            grid=grid,
            in_specs=[
                pl.BlockSpec((cp, lt), lambda j: (0, j)),   # column tile of x
                pl.BlockSpec((cp, cp), lambda j: (0, 0)),   # weight, resident
                pl.BlockSpec((cp, 1), lambda j: (0, 0)),    # bias column, resident
            ],
            out_specs=pl.BlockSpec((cp, lt), lambda j: (0, j)),
        ),
        compiler_params=pltpu.CompilerParams(
            dimension_semantics=("parallel",),
        ),
    )(x2d, w2, b2)

    # Drop channel/lane padding and restore (N, C, L).
    out = out2d[:c, :total].reshape(c, n, l)
    return jnp.transpose(out, (1, 0, 2))


if __name__ == "__main__":
    key = jax.random.PRNGKey(0)
    N, C, L = 2, 4, 16
    k_x, k_w, k_b, k_dead = jax.random.split(key, 4)

    x = jax.random.normal(k_x, (N, C, L), dtype=jnp.float32)

    # BasicBlock_1.end : nn.Conv1d(C, C, 1) -> weight (C, C, 1), bias (C,)
    w_end = jax.random.normal(k_w, (C, C, 1), dtype=jnp.float32) * 0.1
    b_end = jax.random.normal(k_b, (C,), dtype=jnp.float32) * 0.1

    # Parameters of the 3 BasicBlock_0 layers inside `bottle` exist in the
    # PyTorch module but are provably dead code for the output (BasicBlock_0
    # returns its input unchanged); created here only for completeness.
    _dead_bottle_weights = [
        jax.random.normal(k, (C, C, 3), dtype=jnp.float32) * 0.1
        for k in jax.random.split(k_dead, 9)
    ]
    del _dead_bottle_weights

    out = basic_block_1_forward(x, w_end[:, :, 0], b_end)
    out = jax.block_until_ready(out)

    # Plain-JAX reference of the effective forward: relu(W_end @ (2x) + b_end)
    ref = jnp.maximum(
        jnp.einsum("oc,ncl->nol", w_end[:, :, 0], 2.0 * x) + b_end[None, :, None],
        0.0,
    )
    assert out.shape == (N, C, L) and out.dtype == jnp.float32
    assert jnp.allclose(out, ref, atol=1e-5, rtol=1e-5), "Pallas kernel mismatch vs reference"

    print("KERNEL_OK")
</pallas_src>

<mosaic_0001>
module attributes {stable_mosaic.version = 11 : i64} {
  func.func @_block1_end_kernel(%arg0: i32, %arg1: memref<8x128xf32, #tpu.memory_space<vmem>>, %arg2: memref<8x8xf32, #tpu.memory_space<vmem>>, %arg3: memref<8x1xf32, #tpu.memory_space<vmem>>, %arg4: memref<8x128xf32, #tpu.memory_space<vmem>>) attributes {dimension_semantics = [#tpu.dimension_semantics<parallel>], iteration_bounds = array<i64: 1>, scalar_prefetch = 0 : i64, scratch_operands = 0 : i64, tpu.core_type = #tpu.core_type<tc>, window_params = [{transform_indices = @transform_0, window_bounds = array<i64: 8, 128>}, {pipeline_mode = #tpu.pipeline_mode<synchronous>, transform_indices = @transform_1, window_bounds = array<i64: 8, 8>}, {pipeline_mode = #tpu.pipeline_mode<synchronous>, transform_indices = @transform_2, window_bounds = array<i64: 8, 1>}, {transform_indices = @transform_3, window_bounds = array<i64: 8, 128>}]} {
    %c0 = arith.constant 0 : index
    %c0_0 = arith.constant 0 : index
    %0 = vector.load %arg2[%c0, %c0_0] : memref<8x8xf32, #tpu.memory_space<vmem>>, vector<8x8xf32>
    %c0_1 = arith.constant 0 : index
    %c0_2 = arith.constant 0 : index
    %1 = vector.load %arg1[%c0_1, %c0_2] : memref<8x128xf32, #tpu.memory_space<vmem>>, vector<8x128xf32>
    %cst = arith.constant dense<0.000000e+00> : vector<8x128xf32>
    %2 = tpu.matmul %0, %1, %cst {dimension_numbers = #tpu.dot_dimension_numbers<[1], [0], [0], [1], [0, 0, 1, 1], [], []>} : vector<8x8xf32>, vector<8x128xf32>, vector<8x128xf32> -> vector<8x128xf32>
    %c0_3 = arith.constant 0 : index
    %c0_4 = arith.constant 0 : index
    %3 = vector.load %arg3[%c0_3, %c0_4] : memref<8x1xf32, #tpu.memory_space<vmem>>, vector<8x1xf32>
    %4 = vector.broadcast %3 : vector<8x1xf32> to vector<8x128xf32>
    %5 = arith.addf %2, %4 : vector<8x128xf32>
    %cst_5 = arith.constant 0.000000e+00 : f32
    %6 = vector.broadcast %cst_5 : f32 to vector<8x128xf32>
    %7 = arith.maximumf %5, %6 : vector<8x128xf32>
    %c0_6 = arith.constant 0 : index
    %c0_7 = arith.constant 0 : index
    %8 = vector.load %arg4[%c0_6, %c0_7] : memref<8x128xf32, #tpu.memory_space<vmem>>, vector<8x128xf32>
    tpu.vector_store %arg4[%c0_6, %c0_7], %7 {strides = array<i32>} : memref<8x128xf32, #tpu.memory_space<vmem>>, vector<8x128xf32>,
    return
  }
  func.func @transform_0(%arg0: i32) -> (i32, i32) {
    %c0_i32 = arith.constant 0 : i32
    %c0_i32_0 = arith.constant 0 : i32
    return %c0_i32, %arg0 : i32, i32
  }
  func.func @transform_1(%arg0: i32) -> (i32, i32) {
    %c0_i32 = arith.constant 0 : i32
    %c0_i32_0 = arith.constant 0 : i32
    %c0_i32_1 = arith.constant 0 : i32
    return %c0_i32, %c0_i32_0 : i32, i32
  }
  func.func @transform_2(%arg0: i32) -> (i32, i32) {
    %c0_i32 = arith.constant 0 : i32
    %c0_i32_0 = arith.constant 0 : i32
    %c0_i32_1 = arith.constant 0 : i32
    return %c0_i32, %c0_i32_0 : i32, i32
  }
  func.func @transform_3(%arg0: i32) -> (i32, i32) {
    %c0_i32 = arith.constant 0 : i32
    %c0_i32_0 = arith.constant 0 : i32
    return %c0_i32, %arg0 : i32, i32
  }
}

</mosaic_0001>

<bundles_post_ra>
// kernel: tpu_custom_call.1
= control target key start
LH: loop header
LB: loop body
LE: loop exit
PB: predicated region body
PF: predicated region fallthrough
CT: control target
= control target key end

     0   :  { %8 = vsyncpa [#allocation3], 0  ;;  %s221_s0 = inlined_call_operand.vmem [shape: f32[8,128], index: 0, kind: input, shape index: {}]   ;;  %s222_s1 = inlined_call_operand.hbm [shape: f32[8,8], index: 1, kind: input, shape index: {}]   ;;  %s223_s2 = inlined_call_operand.vmem [shape: f32[8,1], index: 2, kind: input, shape index: {}]   ;;  %s224_s3 = inlined_call_operand.hbm [shape: f32[8,128], index: 3, kind: output, shape index: {}]  }
   0x1   :  { %9 = vsyncpa [#allocation4], 0  ;;  %s184_s12 = smov [#allocation2]  }
   0x2   :  { %s18_s13 = sshll.u32 %s184_s12, 4  ;;  %s19_s13 = int_to_ptr.vmem [resolvable:$true] %s18_s13 }
   0x3   :  { %s148_s14 = scalar_lea.vmem %s19_s13, 128  ;;  %p153_p1 = scmp.lt.s32.totalorder %s19_s13, %s19_s13 }
   0x4   :  { %p149_p0 = scmp.ne.s32.totalorder %s19_s13, %s148_s14  ;;  %p154_p2 = scmp.lt.s32.totalorder %s148_s14, %s148_s14 }
   0x6   :  { %p155_p3 = por %p154_p2, %p153_p1 }
   0x8   :  { %p156_p4 = pnand %p155_p3, %p149_p0 }
   0xa   :  { %159 = shalt.err (!%p156_p4)
}
   0xb   :  { %21 = dma.hbm_to_vmem [thread:$0]  %s222_s1, 128, %s19_s13, [#allocation3]  }
   0xc   :  { %180 = dma.done.wait [#allocation3], 128  }
   0xd   :  { %181 = vsyncadd [#allocation3], 4294967168  ;;  %v185_v0 = vmov 0.0   ;;  %vm186_vm0 = vmmov 0   ;;  %v187_v1 = vmov 0   ;;  %vm35_vm1 = vcmask 64512  }
   0xe   :  { %129 = vmatprep.subr.mxu0 %v185_v0  ;;  %131 = vmatprep.mubr.msk.f32.mxu0 %vm186_vm0, %v185_v0  ;;  %v28_v2 = vld [vmem:[%s221_s0] sm:$0xff]  ;;  %s188_s1 = smov [#allocation5]  }
   0xf   :  { %139 = vset.pattern.permute.xlu0 %v187_v1  ;;  %v27_v3 = vld [vmem:[#allocation2] sm:$0xff]  ;;  %130 = vmatpush3.msra.mxu0 %v28_v2  ;;  %s117_s21 = sshll.u32 %s188_s1, 4  ;;  %s118_s21 = int_to_ptr.vmem [resolvable:$true] %s117_s21 }
  0x10   :  { %v29_v4 = vld [vmem:[%s223_s2] sm:$0xff]  ;;  %132 = vmatmul.mubr.msk.f32.vlgmr.msra.gmra.mxu0 %vm35_vm1, %v27_v3  ;;  %s160_s22 = scalar_lea.vmem %s118_s21, 128  ;;  %p165_p6 = scmp.lt.s32.totalorder %s118_s21, %s118_s21 }
  0x11   :  { %32 = vperm.xlu0 %139, %v29_v4   ;;  %p161_p5 = scmp.ne.s32.totalorder %s118_s21, %s160_s22  ;;  %p166_p7 = scmp.lt.s32.totalorder %s160_s22, %s160_s22 }
  0x13   :  { %p167_p8 = por %p166_p7, %p165_p6 }
  0x15   :  { %p168_p9 = pnand %p167_p8, %p161_p5 }
  0x8c   :  { %v33_v5 = vpop.permute.xlu0 %32 }
  0xd0   :  { %v105_v6 = vpop.f32.mrf.mxu0 }
  0xd1   :  { %v106_v7 = vadd.f32 %v105_v6, %v33_v5 }
  0xd2   :  { %v133_v8 = vpop.f32.mrf.mxu0 }
  0xd3   :  { %v109_v9 = vmax.f32 %v106_v7, 0.0 }
  0xd5   :  { %110 = vst [vmem:[#allocation5] sm:$0xff] %v109_v9 }
  0xd6   :  { %171 = shalt.err (!%p168_p9)
}
  0xd7   :  { %120 = dma.vmem_to_hbm [thread:$0]  %s118_s21, 128, %s224_s3, [#allocation4]  }
  0xd8   :  { %182 = dma.done.wait [#allocation4], 128  }
  0xd9   :  { %183 = vsyncadd [#allocation4], 4294967168 }
  0xda   :  { %124 = vsyncpa [#allocation3], 1 }
  0xdb   :  { %125 = vsyncpa [#allocation4], 1 }

</bundles_post_ra>
